<compile_context>
chip_gen: v7x
topology: tpu7x:2x2x1
jax: 0.10.0
libtpu: 0.0.40
codegen_flags: <defaults>
</compile_context>

<pallas_src>
import jax
import jax.numpy as jnp
from jax import lax
from jax.experimental import pallas as pl
from jax.experimental.pallas import tpu as pltpu


# Size x tiles by bytes, not rows: ~12 MiB per tile -> two double-buffered
# copies (~24 MiB) + headroom fit v7x's 64 MiB physical VMEM, and tiles stay
# large enough for small/medium D to sit near the HBM roofline on v5e/v6e too.
_X_TILE_TARGET_BYTES = 12 << 20
_ROW_QUANTUM = 256          # multiple of 256 keeps the lane-dense out block a
                            # multiple of 128 and the x block a multiple of 8
_VMEM_HEADROOM_BYTES = 4 << 20


def _choose_tile_m(M, D, itemsize):
    rows = _X_TILE_TARGET_BYTES // max(D * itemsize, 1)
    rows = max((rows // _ROW_QUANTUM) * _ROW_QUANTUM, _ROW_QUANTUM)
    if rows >= M:
        return M            # single full-extent block (always layout-legal)
    return rows


def _vmem_limit_bytes(tile_m, D, x_itemsize, out_itemsize, extra_per_row=0):
    # 2 buffers for the streamed x tile + 2 for the resident weight row +
    # 2 for the lane-dense output tile (+ optional extra streams) + headroom.
    return int(2 * tile_m * D * x_itemsize
               + 2 * D * x_itemsize
               + 2 * tile_m * out_itemsize
               + 2 * tile_m * extra_per_row
               + _VMEM_HEADROOM_BYTES)


def _matvec_lane_dense(x_tile, w_row):
    # (1, D) . (tile_m, D)^T -> (1, tile_m): lane-dense logits.  Contraction on
    # the last (lane) axis of both operands, f32 accumulation on the MXU; the
    # MXU is idle by construction at ~2 FLOP/byte, so no padding/restructuring.
    return lax.dot_general(
        w_row, x_tile,
        dimension_numbers=(((1,), (1,)), ((), ())),
        preferred_element_type=jnp.float32)


def _logits_kernel(x_ref, w_ref, b_ref, o_ref):
    z = _matvec_lane_dense(x_ref[...], w_ref[...]) + b_ref[0, 0]
    o_ref[...] = z.astype(o_ref.dtype)


def _bce_rows_kernel(x_ref, w_ref, b_ref, y_ref, loss_ref):
    z = _matvec_lane_dense(x_ref[...], w_ref[...]) + b_ref[0, 0]   # (1, tile_m) f32
    y = y_ref[...]
    # Numerically stable elementwise BCE-with-logits (same form PyTorch uses).
    # Purely elementwise, so padded lanes of a partial last tile are harmless:
    # Pallas write-masks the output block, only valid rows reach HBM.
    loss_ref[...] = (jnp.maximum(z, 0.0) - z * y
                     + jnp.log1p(jnp.exp(-jnp.abs(z))))


def self_critic_forward(embeds, w, b, labels=None, *, out_dtype=None):
    """SelfCritic.forward minus the wrapped `net`.

    embeds: [B, N, D] (any float dtype; streamed as-is, no up-cast)
    w:      [D] or [D, 1]   -- nn.Linear(dim, 1) weight
    b:      scalar          -- nn.Linear(dim, 1) bias
    labels: optional [B, N] -> scalar BCE-with-logits loss; else [B, N, 1] logits
    out_dtype: logits dtype (defaults to embeds.dtype to halve writeback traffic)
    """
    B, N, D = embeds.shape
    M = B * N

    x2 = embeds.reshape(M, D)                         # native dtype, no cast
    x_itemsize = jnp.dtype(x2.dtype).itemsize
    tile_m = _choose_tile_m(M, D, x_itemsize)
    grid = (pl.cdiv(M, tile_m),)

    # Weight is streamed in the embedding dtype (mem-bound kernel; f32 accumulate
    # on the MXU).  Keep w in f32 here instead if exact nn.Linear bit-parity matters.
    w2 = jnp.asarray(w).reshape(1, D).astype(x2.dtype)
    b2 = jnp.asarray(b, jnp.float32).reshape(1, 1)    # scalar -> SMEM

    x_spec = pl.BlockSpec((tile_m, D), lambda i: (i, 0))
    w_spec = pl.BlockSpec((1, D), lambda i: (0, 0))                  # resident
    b_spec = pl.BlockSpec((1, 1), lambda i: (0, 0),
                          memory_space=pltpu.MemorySpace.SMEM)       # scalar

    if labels is None:
        out_dtype = x2.dtype if out_dtype is None else out_dtype
        out_itemsize = jnp.dtype(out_dtype).itemsize
        logits = pl.pallas_call(
            _logits_kernel,
            out_shape=jax.ShapeDtypeStruct((1, M), out_dtype),
            grid=grid,
            in_specs=[x_spec, w_spec, b_spec],
            out_specs=pl.BlockSpec((1, tile_m), lambda i: (0, i)),   # lane-dense
            compiler_params=pltpu.CompilerParams(
                dimension_semantics=("parallel",),
                vmem_limit_bytes=_vmem_limit_bytes(
                    tile_m, D, x_itemsize, out_itemsize)),
            cost_estimate=pl.CostEstimate(
                flops=2 * M * D,
                transcendentals=0,
                bytes_accessed=M * D * x_itemsize + D * x_itemsize
                + M * out_itemsize),
        )(x2, w2, b2)
        return logits.reshape(B, N, 1)

    y2 = labels.reshape(1, M).astype(jnp.float32)
    y_spec = pl.BlockSpec((1, tile_m), lambda i: (0, i))
    loss_rows = pl.pallas_call(
        _bce_rows_kernel,
        out_shape=jax.ShapeDtypeStruct((1, M), jnp.float32),
        grid=grid,
        in_specs=[x_spec, w_spec, b_spec, y_spec],
        out_specs=pl.BlockSpec((1, tile_m), lambda i: (0, i)),       # lane-dense
        compiler_params=pltpu.CompilerParams(
            dimension_semantics=("parallel",),                       # both v7x TCs
            vmem_limit_bytes=_vmem_limit_bytes(
                tile_m, D, x_itemsize, 4, extra_per_row=4)),
        cost_estimate=pl.CostEstimate(
            flops=2 * M * D + 6 * M,
            transcendentals=2 * M,
            bytes_accessed=M * D * x_itemsize + D * x_itemsize + 2 * M * 4),
    )(x2, w2, b2, y2)
    # Final mean over per-row losses: tiny XLA reduction (M f32 values); keeps
    # the grid axis fully parallel instead of a serialized scalar accumulator.
    return jnp.sum(loss_rows) / M


if __name__ == "__main__":
    B, N, D, VOCAB = 2, 8, 32, 64

    key = jax.random.PRNGKey(0)
    k_tok, k_emb, k_w, k_b, k_lab = jax.random.split(key, 5)

    # TODO(synk): the wrapped `net` (a Transformer called with return_embed=True)
    # is external to SelfCritic; stubbed here as a deterministic embedding lookup.
    token_ids = jax.random.randint(k_tok, (B, N), 0, VOCAB, dtype=jnp.int32)
    embed_table = jax.random.normal(k_emb, (VOCAB, D), jnp.float32).astype(jnp.bfloat16)
    embeds = embed_table[token_ids]                  # [B, N, D] bf16, plain-JAX glue

    # nn.Linear(net.dim, 1) params, PyTorch-style uniform(-1/sqrt(D), 1/sqrt(D))
    bound = 1.0 / float(D) ** 0.5
    w = jax.random.uniform(k_w, (D, 1), jnp.float32, -bound, bound)
    b = jax.random.uniform(k_b, (1,), jnp.float32, -bound, bound)[0]

    labels = jax.random.bernoulli(k_lab, 0.5, (B, N)).astype(jnp.float32)

    # path 1: no labels -> logits [B, N, 1] (default dtype = embeds.dtype = bf16)
    logits = jax.block_until_ready(self_critic_forward(embeds, w, b))
    # path 2: with labels -> scalar BCE-with-logits loss
    loss = jax.block_until_ready(self_critic_forward(embeds, w, b, labels=labels))

    # pure-JAX reference (same bf16 quantization of inputs the kernel sees)
    x_f32 = embeds.astype(jnp.float32)
    w_f32 = w.reshape(D).astype(jnp.bfloat16).astype(jnp.float32)
    z_ref = jnp.sum(x_f32 * w_f32[None, None, :], axis=-1) + b       # [B, N]
    ref_logits = z_ref[..., None]
    ref_loss = jnp.mean(jnp.maximum(z_ref, 0.0) - z_ref * labels
                        + jnp.log1p(jnp.exp(-jnp.abs(z_ref))))

    assert logits.shape == (B, N, 1)
    assert logits.dtype == embeds.dtype
    # logits are bf16 by default -> compare with bf16-appropriate tolerance
    assert jnp.allclose(logits.astype(jnp.float32), ref_logits,
                        atol=1e-2, rtol=1e-2), (
        float(jnp.max(jnp.abs(logits.astype(jnp.float32) - ref_logits))))
    assert jnp.allclose(loss, ref_loss, atol=1e-3, rtol=1e-3), (
        float(loss), float(ref_loss))

    print("KERNEL_OK")
</pallas_src>

<mosaic_0001>
module attributes {stable_mosaic.version = 11 : i64} {
  func.func @_logits_kernel(%arg0: i32, %arg1: memref<16x32xbf16, #tpu.memory_space<vmem>>, %arg2: memref<1x32xbf16, #tpu.memory_space<vmem>>, %arg3: memref<1x1xf32, #tpu.memory_space<smem>>, %arg4: memref<1x16xbf16, #tpu.memory_space<vmem>>) attributes {dimension_semantics = [#tpu.dimension_semantics<parallel>], iteration_bounds = array<i64: 1>, scalar_prefetch = 0 : i64, scratch_operands = 0 : i64, tpu.core_type = #tpu.core_type<tc>, window_params = [{transform_indices = @transform_0, window_bounds = array<i64: 16, 32>}, {pipeline_mode = #tpu.pipeline_mode<synchronous>, transform_indices = @transform_1, window_bounds = array<i64: 1, 32>}, {transform_indices = @transform_2, window_bounds = array<i64: 1, 1>}, {transform_indices = @transform_3, window_bounds = array<i64: 1, 16>}]} {
    %c0 = arith.constant 0 : index
    %c0_0 = arith.constant 0 : index
    %0 = vector.load %arg1[%c0, %c0_0] : memref<16x32xbf16, #tpu.memory_space<vmem>>, vector<16x32xbf16>
    %c0_1 = arith.constant 0 : index
    %c0_2 = arith.constant 0 : index
    %1 = vector.load %arg2[%c0_1, %c0_2] : memref<1x32xbf16, #tpu.memory_space<vmem>>, vector<1x32xbf16>
    %cst = arith.constant dense<0.000000e+00> : vector<1x16xf32>
    %2 = tpu.matmul %1, %0, %cst {dimension_numbers = #tpu.dot_dimension_numbers<[1], [1], [0], [0], [0, 0, 1, 0], [], []>} : vector<1x32xbf16>, vector<16x32xbf16>, vector<1x16xf32> -> vector<1x16xf32>
    %c0_3 = arith.constant 0 : index
    %c0_4 = arith.constant 0 : index
    %3 = memref.load %arg3[%c0_3, %c0_4] : memref<1x1xf32, #tpu.memory_space<smem>>
    %4 = vector.broadcast %3 : f32 to vector<1x16xf32>
    %5 = arith.addf %2, %4 : vector<1x16xf32>
    %6 = arith.truncf %5 : vector<1x16xf32> to vector<1x16xbf16>
    %c0_5 = arith.constant 0 : index
    %c0_6 = arith.constant 0 : index
    %7 = vector.load %arg4[%c0_5, %c0_6] : memref<1x16xbf16, #tpu.memory_space<vmem>>, vector<1x16xbf16>
    tpu.vector_store %arg4[%c0_5, %c0_6], %6 {strides = array<i32>} : memref<1x16xbf16, #tpu.memory_space<vmem>>, vector<1x16xbf16>,
    return
  }
  func.func @transform_0(%arg0: i32) -> (i32, i32) {
    %c0_i32 = arith.constant 0 : i32
    %c0_i32_0 = arith.constant 0 : i32
    return %arg0, %c0_i32 : i32, i32
  }
  func.func @transform_1(%arg0: i32) -> (i32, i32) {
    %c0_i32 = arith.constant 0 : i32
    %c0_i32_0 = arith.constant 0 : i32
    %c0_i32_1 = arith.constant 0 : i32
    return %c0_i32, %c0_i32_0 : i32, i32
  }
  func.func @transform_2(%arg0: i32) -> (i32, i32) {
    %c0_i32 = arith.constant 0 : i32
    %c0_i32_0 = arith.constant 0 : i32
    %c0_i32_1 = arith.constant 0 : i32
    return %c0_i32, %c0_i32_0 : i32, i32
  }
  func.func @transform_3(%arg0: i32) -> (i32, i32) {
    %c0_i32 = arith.constant 0 : i32
    %c0_i32_0 = arith.constant 0 : i32
    return %c0_i32, %arg0 : i32, i32
  }
}

</mosaic_0001>

<bundles_post_ra>
// kernel: tpu_custom_call.1
= control target key start
LH: loop header
LB: loop body
LE: loop exit
PB: predicated region body
PF: predicated region fallthrough
CT: control target
= control target key end

     0   :  { %9 = vsyncpa [#allocation4], 0  ;;  %s231_s0 = inlined_call_operand.hbm [shape: bf16[16,32], index: 0, kind: input, shape index: {}]   ;;  %s232_s1 = inlined_call_operand.vmem [shape: bf16[1,32], index: 1, kind: input, shape index: {}]   ;;  %s233_s2 = inlined_call_operand.<no memory space> [shape: f32[1,1], index: 2, kind: input, shape index: {}]   ;;  %s234_s3 = inlined_call_operand.hbm [shape: bf16[1,16], index: 3, kind: output, shape index: {}]  }
   0x1   :  { %10 = vsyncpa [#allocation5], 0  ;;  %s175_s12 = smov [#allocation3]   ;;  %s127_s16 = scalar_lea.hbm %s231_s0, 128 }
   0x2   :  { %s16_s13 = sshll.u32 %s175_s12, 4  ;;  %p128_p0 = scmp.ne.s32.totalorder %s231_s0, %s127_s16  ;;  %s17_s13 = int_to_ptr.vmem [resolvable:$true] %s16_s13 }
   0x3   :  { %p131_p1 = scmp.lt.u32.totalorder %s127_s16, %s231_s0 }
   0x5   :  { %p133_p2 = pnand %p131_p1, %p128_p0 }
   0x7   :  { %136 = shalt.err (!%p133_p2)
}
   0x8   :  { %s137_s21 = scalar_lea.vmem %s17_s13, 128  ;;  %p142_p4 = scmp.lt.s32.totalorder %s17_s13, %s17_s13 }
   0x9   :  { %p138_p3 = scmp.ne.s32.totalorder %s17_s13, %s137_s21  ;;  %p143_p5 = scmp.lt.s32.totalorder %s137_s21, %s137_s21 }
   0xb   :  { %p144_p6 = por %p143_p5, %p142_p4 }
   0xd   :  { %p145_p7 = pnand %p144_p6, %p138_p3 }
   0xf   :  { %148 = shalt.err (!%p145_p7)
}
  0x10   :  { %s176_s22 = smov 64   ;;  %s177_s23 = smov 4  }
  0x11   :  { %22 = dma.hbm_to_vmem [thread:$0]  %s231_s0, 128, %s17_s13, [#allocation4], %s176_s22, %s176_s22, %s177_s23  }
  0x12   :  { %171 = dma.done.wait [#allocation4], 128  }
  0x13   :  { %172 = vsyncadd [#allocation4], 4294967168  ;;  %v178_v0 = vmov 0.0   ;;  %vm179_vm0 = vmmov 0   ;;  %vm41_vm1 = vcmask 261120   ;;  %v126_v1 = vld [vmem:[#allocation3] sm:$0xff]   ;;  %v35_v4 = vstv %s233_s2 }
  0x14   :  { %114 = vmatprep.subr.bf16.mxu0 %v178_v0  ;;  %116 = vmatprep.mubr.msk.bf16.mxu0 %vm179_vm0, %v178_v0  ;;  %v46_v2 = vsel %vm41_vm1, %v126_v1, 0  ;;  %v33_v3 = vld [vmem:[%s232_s1] sm:$0x1]  ;;  %vm89_vm2 = vcmask 122880   ;;  %vm90_vm3 = vsmask.f32 256 }
  0x15   :  { %115 = vmatpush3.bf16.xpose.msra.mxu0 %v46_v2  ;;  %s180_s0 = smov [#allocation6]   ;;  %vm91_vm4 = vmand %vm89_vm2, %vm90_vm3  ;;  %v92_v9 = vld [vmem:[#allocation6] sm:$0x1] }
  0x16   :  { %s101_s30 = sshll.u32 %s180_s0, 4  ;;  %s102_s30 = int_to_ptr.vmem [resolvable:$true] %s101_s30 }
  0x17   :  { %s149_s1 = scalar_lea.vmem %s102_s30, 16  ;;  %s153_s4 = scalar_lea.vmem %s102_s30, 32 }
  0x18   :  { %p150_p8 = scmp.ne.s32.totalorder %s102_s30, %s149_s1  ;;  %p154_p9 = scmp.lt.s32.totalorder %s102_s30, %s102_s30 }
  0x19   :  { %p155_p10 = scmp.lt.s32.totalorder %s153_s4, %s149_s1 }
  0x1b   :  { %p156_p11 = por %p155_p10, %p154_p9 }
  0x1c   :  { %117 = vmatmul.mubr.msk.bf16.vlgmr.msra.gmra.mrb[0].mxu0 %vm41_vm1, %v33_v3 }
  0x1d   :  { %p157_p12 = pnand %p156_p11, %p150_p8 }
  0xef   :  { %v82_v5 = vpop.f32.mrb[0].mxu0 }
  0xf0   :  { %v83_v6 = vadd.f32 %v82_v5, %v35_v4  ;;  %v118_v7 = vpop.f32.mrb[1].mxu0 }
  0xf1   :  { %v85_v8 = vpop.f32.mrb[2].mxu0 }
  0xf2   :  { %v88_v10 = vpack.c.bf16 %v83_v6, %v83_v6  ;;  %v119_v11 = vpop.f32.mrb[3].mxu0 }
  0xf4   :  { %v93_v12 = vsel %vm91_vm4, %v88_v10, %v92_v9 }
  0xf5   :  { %94 = vst [vmem:[#allocation6] sm:$0x1] %v93_v12 }
  0xf6   :  { %160 = shalt.err (!%p157_p12)
}
  0xf7   :  { %s161_s6 = scalar_lea.hbm %s234_s3, 16 }
  0xf8   :  { %p162_p13 = scmp.ne.s32.totalorder %s234_s3, %s161_s6  ;;  %p165_p0 = scmp.lt.u32.totalorder %s161_s6, %s234_s3 }
  0xfa   :  { %p167_p1 = pnand %p165_p0, %p162_p13 }
  0xfc   :  { %170 = shalt.err (!%p167_p1)
}
  0xfd   :  { %104 = dma.vmem_to_hbm [thread:$0]  %s102_s30, 16, %s234_s3, [#allocation5]  }
  0xfe   :  { %173 = dma.done.wait [#allocation5], 16  }
  0xff   :  { %174 = vsyncadd [#allocation5], 4294967280 }
 0x100   :  { %108 = vsyncpa [#allocation4], 1 }
 0x101   :  { %109 = vsyncpa [#allocation5], 1 }

</bundles_post_ra>
